<compile_context>
chip_gen: v7x
topology: tpu7x:2x2x1
jax: 0.10.0
libtpu: 0.0.40
codegen_flags: <defaults>
</compile_context>

<pallas_src>
import functools

import jax
import jax.numpy as jnp
from jax.experimental import pallas as pl
from jax.experimental.pallas import tpu as pltpu


def _layernorm_channel_kernel(x_ref, w_ref, b_ref, o_ref, *, eps, inv_c):
    # x_ref : (Bt, C, T)    w_ref, b_ref : (C, 1)    o_ref : (Bt, C, T)
    x = x_ref[...].astype(jnp.float32)                    # f32 statistics always
    # One sweep over the block: accumulate sum(x) and sum(x*x) together.
    u = jnp.sum(x, axis=1, keepdims=True) * inv_c         # (Bt, 1, T) channel mean
    ex2 = jnp.sum(x * x, axis=1, keepdims=True) * inv_c   # (Bt, 1, T) E[x^2]
    var = jnp.maximum(ex2 - u * u, 0.0)                   # guard tiny cancellation
    inv = jax.lax.rsqrt(var + eps)                        # EUP rsqrt (free slot)
    y = (x - u) * inv * w_ref[...] + b_ref[...]           # per-channel affine
    o_ref[...] = y.astype(o_ref.dtype)


def _choose_tiles(B, C, HW):
    """Pick (batch_tile, spatial_tile) from a per-block VMEM budget."""
    LANE = 128
    PER_BLOCK_BUDGET = 4 << 20          # bytes of f32 per pipelined block (~6 resident)
    hw128 = pl.cdiv(HW, LANE) * LANE
    max_thw = max(LANE, (PER_BLOCK_BUDGET // (C * 4)) // LANE * LANE)
    if hw128 <= max_thw:
        # Whole spatial extent fits in one block: batch-tile to amortize the
        # ~0.35 us per-grid-step fixed cost on small-HW / small-C shapes.
        t_hw = HW                                        # full dim -> no lane masking
        bt = min(B, max(1, PER_BLOCK_BUDGET // (C * hw128 * 4)))
    else:
        t_hw = max_thw                                   # multiple of 128; ragged last
        bt = 1                                           # tile masked by Pallas
    return bt, t_hw


def layernorm_channel(x_nchw, weight, bias, eps=1e-5):
    B, C, H, W = x_nchw.shape
    HW = H * W
    x = x_nchw.reshape(B, C, HW)                          # contiguous view reshape

    bt, t_hw = _choose_tiles(B, C, HW)
    grid = (pl.cdiv(B, bt), pl.cdiv(HW, t_hw))

    w2 = weight.reshape(C, 1).astype(jnp.float32)
    b2 = bias.reshape(C, 1).astype(jnp.float32)

    kernel = functools.partial(
        _layernorm_channel_kernel, eps=float(eps), inv_c=1.0 / C)

    itemsize = jnp.dtype(x_nchw.dtype).itemsize
    cost = pl.CostEstimate(
        flops=7 * B * C * HW,
        transcendentals=B * HW,
        bytes_accessed=2 * B * C * HW * itemsize + 2 * C * 4,
    )

    out = pl.pallas_call(
        kernel,
        out_shape=jax.ShapeDtypeStruct((B, C, HW), x_nchw.dtype),
        grid=grid,
        in_specs=[
            pl.BlockSpec((bt, C, t_hw), lambda b, t: (b, 0, t)),
            pl.BlockSpec((C, 1), lambda b, t: (0, 0)),
            pl.BlockSpec((C, 1), lambda b, t: (0, 0)),
        ],
        out_specs=pl.BlockSpec((bt, C, t_hw), lambda b, t: (b, 0, t)),
        compiler_params=pltpu.CompilerParams(
            dimension_semantics=("parallel", "parallel"),
            vmem_limit_bytes=48 << 20,
        ),
        cost_estimate=cost,
    )(x, w2, b2)

    return out.reshape(B, C, H, W)


if __name__ == "__main__":
    B, C, H, W = 2, 4, 16, 16
    eps = 1e-5
    key = jax.random.PRNGKey(0)
    kx, kw, kb = jax.random.split(key, 3)
    x = jax.random.normal(kx, (B, C, H, W), jnp.float32)
    weight = 1.0 + 0.1 * jax.random.normal(kw, (C,), jnp.float32)
    bias = 0.1 * jax.random.normal(kb, (C,), jnp.float32)

    out = jax.jit(functools.partial(layernorm_channel, eps=eps))(x, weight, bias)
    jax.block_until_ready(out)

    # Pure-JAX reference (mirrors the PyTorch forward exactly).
    u = x.mean(1, keepdims=True)
    s = ((x - u) ** 2).mean(1, keepdims=True)
    ref = (x - u) / jnp.sqrt(s + eps)
    ref = weight[None, :, None, None] * ref + bias[None, :, None, None]

    assert out.shape == (B, C, H, W) and out.dtype == jnp.float32
    assert jnp.allclose(out, ref, atol=1e-5, rtol=1e-5)
    print("KERNEL_OK")
</pallas_src>

<mosaic_0001>
module attributes {stable_mosaic.version = 11 : i64} {
  func.func @_layernorm_channel_kernel(%arg0: i32, %arg1: i32, %arg2: memref<2x4x256xf32, #tpu.memory_space<vmem>>, %arg3: memref<4x1xf32, #tpu.memory_space<vmem>>, %arg4: memref<4x1xf32, #tpu.memory_space<vmem>>, %arg5: memref<2x4x256xf32, #tpu.memory_space<vmem>>) attributes {dimension_semantics = [#tpu.dimension_semantics<parallel>, #tpu.dimension_semantics<parallel>], iteration_bounds = array<i64: 1, 1>, scalar_prefetch = 0 : i64, scratch_operands = 0 : i64, tpu.core_type = #tpu.core_type<tc>, window_params = [{transform_indices = @transform_0, window_bounds = array<i64: 2, 4, 256>}, {pipeline_mode = #tpu.pipeline_mode<synchronous>, transform_indices = @transform_1, window_bounds = array<i64: 4, 1>}, {pipeline_mode = #tpu.pipeline_mode<synchronous>, transform_indices = @transform_2, window_bounds = array<i64: 4, 1>}, {transform_indices = @transform_3, window_bounds = array<i64: 2, 4, 256>}]} {
    %c0 = arith.constant 0 : index
    %c0_0 = arith.constant 0 : index
    %c0_1 = arith.constant 0 : index
    %0 = vector.load %arg2[%c0, %c0_0, %c0_1] : memref<2x4x256xf32, #tpu.memory_space<vmem>>, vector<2x4x256xf32>
    %cst = arith.constant dense<0.000000e+00> : vector<2x256xf32>
    %1 = vector.multi_reduction <add>, %0, %cst [1] : vector<2x4x256xf32> to vector<2x256xf32>
    %2 = vector.shape_cast %1 : vector<2x256xf32> to vector<2x1x256xf32>
    %cst_2 = arith.constant 2.500000e-01 : f32
    %3 = vector.broadcast %cst_2 : f32 to vector<2x1x256xf32>
    %4 = arith.mulf %2, %3 : vector<2x1x256xf32>
    %5 = arith.mulf %0, %0 : vector<2x4x256xf32>
    %cst_3 = arith.constant dense<0.000000e+00> : vector<2x256xf32>
    %6 = vector.multi_reduction <add>, %5, %cst_3 [1] : vector<2x4x256xf32> to vector<2x256xf32>
    %7 = vector.shape_cast %6 : vector<2x256xf32> to vector<2x1x256xf32>
    %cst_4 = arith.constant 2.500000e-01 : f32
    %8 = vector.broadcast %cst_4 : f32 to vector<2x1x256xf32>
    %9 = arith.mulf %7, %8 : vector<2x1x256xf32>
    %10 = arith.mulf %4, %4 : vector<2x1x256xf32>
    %11 = arith.subf %9, %10 : vector<2x1x256xf32>
    %cst_5 = arith.constant 0.000000e+00 : f32
    %12 = vector.broadcast %cst_5 : f32 to vector<2x1x256xf32>
    %13 = arith.maximumf %11, %12 : vector<2x1x256xf32>
    %cst_6 = arith.constant 9.99999974E-6 : f32
    %14 = vector.broadcast %cst_6 : f32 to vector<2x1x256xf32>
    %15 = arith.addf %13, %14 : vector<2x1x256xf32>
    %16 = math.rsqrt %15 : vector<2x1x256xf32>
    %17 = vector.broadcast %4 : vector<2x1x256xf32> to vector<2x4x256xf32>
    %18 = arith.subf %0, %17 : vector<2x4x256xf32>
    %19 = vector.broadcast %16 : vector<2x1x256xf32> to vector<2x4x256xf32>
    %20 = arith.mulf %18, %19 : vector<2x4x256xf32>
    %c0_7 = arith.constant 0 : index
    %c0_8 = arith.constant 0 : index
    %21 = vector.load %arg3[%c0_7, %c0_8] : memref<4x1xf32, #tpu.memory_space<vmem>>, vector<4x1xf32>
    %22 = vector.shape_cast %21 : vector<4x1xf32> to vector<1x4x1xf32>
    %23 = vector.broadcast %22 : vector<1x4x1xf32> to vector<2x4x256xf32>
    %24 = arith.mulf %20, %23 : vector<2x4x256xf32>
    %c0_9 = arith.constant 0 : index
    %c0_10 = arith.constant 0 : index
    %25 = vector.load %arg4[%c0_9, %c0_10] : memref<4x1xf32, #tpu.memory_space<vmem>>, vector<4x1xf32>
    %26 = vector.shape_cast %25 : vector<4x1xf32> to vector<1x4x1xf32>
    %27 = vector.broadcast %26 : vector<1x4x1xf32> to vector<2x4x256xf32>
    %28 = arith.addf %24, %27 : vector<2x4x256xf32>
    %c0_11 = arith.constant 0 : index
    %c0_12 = arith.constant 0 : index
    %c0_13 = arith.constant 0 : index
    %29 = vector.load %arg5[%c0_11, %c0_12, %c0_13] : memref<2x4x256xf32, #tpu.memory_space<vmem>>, vector<2x4x256xf32>
    tpu.vector_store %arg5[%c0_11, %c0_12, %c0_13], %28 {strides = array<i32>} : memref<2x4x256xf32, #tpu.memory_space<vmem>>, vector<2x4x256xf32>,
    return
  }
  func.func @transform_0(%arg0: i32, %arg1: i32) -> (i32, i32, i32) {
    %c0_i32 = arith.constant 0 : i32
    %c0_i32_0 = arith.constant 0 : i32
    return %arg0, %c0_i32, %arg1 : i32, i32, i32
  }
  func.func @transform_1(%arg0: i32, %arg1: i32) -> (i32, i32) {
    %c0_i32 = arith.constant 0 : i32
    %c0_i32_0 = arith.constant 0 : i32
    %c0_i32_1 = arith.constant 0 : i32
    return %c0_i32, %c0_i32_0 : i32, i32
  }
  func.func @transform_2(%arg0: i32, %arg1: i32) -> (i32, i32) {
    %c0_i32 = arith.constant 0 : i32
    %c0_i32_0 = arith.constant 0 : i32
    %c0_i32_1 = arith.constant 0 : i32
    return %c0_i32, %c0_i32_0 : i32, i32
  }
  func.func @transform_3(%arg0: i32, %arg1: i32) -> (i32, i32, i32) {
    %c0_i32 = arith.constant 0 : i32
    %c0_i32_0 = arith.constant 0 : i32
    return %arg0, %c0_i32, %arg1 : i32, i32, i32
  }
}

</mosaic_0001>

<bundles_post_ra>
// kernel: layernorm_channel.1
= control target key start
LH: loop header
LB: loop body
LE: loop exit
PB: predicated region body
PF: predicated region fallthrough
CT: control target
= control target key end

     0   :  { %v184_v0 = vmov 0   ;;  %vm22_vm0 = vcmask 1043456   ;;  %s248_s1 = inlined_call_operand.vmem [shape: f32[4,1], index: 1, kind: input, shape index: {}]   ;;  %s249_s2 = inlined_call_operand.vmem [shape: f32[4,1], index: 2, kind: input, shape index: {}]   ;;  %s250_s0 = inlined_call_operand.vmem [shape: f32[2,4,256], index: 0, kind: input, shape index: {}]   ;;  %s251_s3 = inlined_call_operand.vmem [shape: f32[2,4,256], index: 3, kind: output, shape index: {}]  }
   0x1   :  { %173 = vset.pattern.permute.xlu0 %v184_v0  ;;  %v135_v1 = vld [vmem:[%s248_s1] sm:$0xf]  ;;  %v220_v4 = vld [vmem:[%s250_s0 + $0x8] sm:$0xff] }
   0x2   :  { %138 = vperm.xlu0 %173, %v135_v1   ;;  %v150_v2 = vld [vmem:[%s249_s2] sm:$0xf]  ;;  %v19_v7 = vcombine.high %v220_v4, %v220_v4  ;;  %v56_v8 = vmul.f32 %v220_v4, %v220_v4  ;;  %v37_v12 = vsel %vm22_vm0, %v220_v4, 0.0 }
   0x3   :  { %v215_v3 = vld [vmem:[%s250_s0] sm:$0xff]  ;;  %v38_v18 = vrot.slane %v37_v12, 4 }
   0x4   :  { %v18_v5 = vcombine.high %v215_v3, %v215_v3  ;;  %v55_v6 = vmul.f32 %v215_v3, %v215_v3  ;;  %v23_v9 = vsel %vm22_vm0, %v215_v3, 0.0  ;;  %v44_v14 = vsel %vm22_vm0, %v19_v7, 0.0 }
   0x5   :  { %v24_v13 = vrot.slane %v23_v9, 4  ;;  %v60_v15 = vcombine.high %v56_v8, %v56_v8  ;;  %v45_v20 = vrot.slane %v44_v14, 4  ;;  %v77_v21 = vsel %vm22_vm0, %v56_v8, 0.0 }
   0x6   :  { %153 = vperm.xlu0 %173, %v150_v2   ;;  %v30_v10 = vsel %vm22_vm0, %v18_v5, 0.0  ;;  %v59_v11 = vcombine.high %v55_v6, %v55_v6  ;;  %v63_v17 = vsel %vm22_vm0, %v55_v6, 0.0  ;;  %v39_v27 = vadd.f32 %v38_v18, %v37_v12 }
   0x7   :  { %v31_v16 = vrot.slane %v30_v10, 4  ;;  %v25_v22 = vadd.f32 %v24_v13, %v23_v9  ;;  %v64_v23 = vrot.slane %v63_v17, 4  ;;  %v84_v24 = vsel %vm22_vm0, %v60_v15, 0.0 }
   0x8   :  { %v70_v19 = vsel %vm22_vm0, %v59_v11, 0.0  ;;  %v78_v28 = vrot.slane %v77_v21, 4  ;;  %v46_v29 = vadd.f32 %v45_v20, %v44_v14  ;;  %v85_v30 = vrot.slane %v84_v24, 4 }
   0x9   :  { %v32_v25 = vadd.f32 %v31_v16, %v30_v10  ;;  %v71_v26 = vrot.slane %v70_v19, 4  ;;  %v26_v31 = vrot.slane %v25_v22, 2  ;;  %v65_v32 = vadd.f32 %v64_v23, %v63_v17 }
   0xa   :  { %v40_v35 = vrot.slane %v39_v27, 2  ;;  %v79_v36 = vadd.f32 %v78_v28, %v77_v21  ;;  %v47_v37 = vrot.slane %v46_v29, 2  ;;  %v86_v38 = vadd.f32 %v85_v30, %v84_v24 }
   0xb   :  { %v33_v33 = vrot.slane %v32_v25, 2  ;;  %v72_v34 = vadd.f32 %v71_v26, %v70_v19  ;;  %v27_v39 = vadd.f32 %v26_v31, %v25_v22  ;;  %v66_v40 = vrot.slane %v65_v32, 2 }
   0xc   :  { %v41_v43 = vadd.f32 %v40_v35, %v39_v27  ;;  %v80_v44 = vrot.slane %v79_v36, 2  ;;  %v48_v45 = vadd.f32 %v47_v37, %v46_v29  ;;  %v87_v46 = vrot.slane %v86_v38, 2 }
   0xd   :  { %v34_v41 = vadd.f32 %v33_v33, %v32_v25  ;;  %v73_v42 = vrot.slane %v72_v34, 2  ;;  %v28_v47 = vrot.slane %v27_v39, 1  ;;  %v67_v48 = vadd.f32 %v66_v40, %v65_v32 }
   0xe   :  { %v42_v51 = vrot.slane %v41_v43, 1  ;;  %v81_v52 = vadd.f32 %v80_v44, %v79_v36  ;;  %v49_v53 = vrot.slane %v48_v45, 1  ;;  %v88_v54 = vadd.f32 %v87_v46, %v86_v38 }
   0xf   :  { %v35_v49 = vrot.slane %v34_v41, 1  ;;  %v74_v50 = vadd.f32 %v73_v42, %v72_v34  ;;  %v29_v55 = vadd.f32 %v28_v47, %v27_v39  ;;  %v68_v56 = vrot.slane %v67_v48, 1 }
  0x10   :  { %v43_v59 = vadd.f32 %v42_v51, %v41_v43  ;;  %v82_v60 = vrot.slane %v81_v52, 1  ;;  %v50_v61 = vadd.f32 %v49_v53, %v48_v45  ;;  %v89_v62 = vrot.slane %v88_v54, 1 }
  0x11   :  { %v36_v57 = vadd.f32 %v35_v49, %v34_v41  ;;  %v75_v58 = vrot.slane %v74_v50, 1  ;;  %v51_v63 = vmul.f32 0.25, %v29_v55  ;;  %v69_v0 = vadd.f32 %v68_v56, %v67_v48 }
  0x12   :  { %v53_v5 = vmul.f32 0.25, %v43_v59  ;;  %v83_v6 = vadd.f32 %v82_v60, %v81_v52  ;;  %v54_v7 = vmul.f32 0.25, %v50_v61  ;;  %v90_v8 = vadd.f32 %v89_v62, %v88_v54 }
  0x13   :  { %v52_v1 = vmul.f32 0.25, %v36_v57  ;;  %v76_v2 = vadd.f32 %v75_v58, %v74_v50  ;;  %v91_v9 = vmul.f32 0.25, %v69_v0  ;;  %v95_v10 = vmul.f32 %v51_v63, %v51_v63 }
  0x14   :  { %v93_v13 = vmul.f32 0.25, %v83_v6  ;;  %v97_v14 = vmul.f32 %v53_v5, %v53_v5  ;;  %v94_v15 = vmul.f32 0.25, %v90_v8  ;;  %v98_v16 = vmul.f32 %v54_v7, %v54_v7 }
  0x15   :  { %v92_v11 = vmul.f32 0.25, %v76_v2  ;;  %v96_v12 = vmul.f32 %v52_v1, %v52_v1  ;;  %v99_v17 = vsub.f32 %v91_v9, %v95_v10  ;;  %v185_v29 = vmov 839922192  }
  0x16   :  { %v101_v19 = vsub.f32 %v93_v13, %v97_v14  ;;  %v102_v20 = vsub.f32 %v94_v15, %v98_v16  ;;  %v141_v30 = vunpack.c.l.s4 %v185_v29  ;;  %v143_v31 = vlaneseq }
  0x17   :  { %v100_v18 = vsub.f32 %v92_v11, %v96_v12  ;;  %v103_v21 = vmax.f32 %v99_v17, 0.0  ;;  %v119_v37 = vcombine.low %v51_v63, %v52_v1  ;;  %v120_v38 = vcombine.low %v53_v5, %v54_v7 }
  0x18   :  { %v105_v23 = vmax.f32 %v101_v19, 0.0  ;;  %v106_v24 = vmax.f32 %v102_v20, 0.0  ;;  %v142_v34 = vunpack.c.0.s8 %v141_v30  ;;  %v144_v35 = vshrl.u32 %v143_v31, 7 }
  0x19   :  { %v104_v22 = vmax.f32 %v100_v18, 0.0  ;;  %v107_v25 = vadd.f32 1e-05, %v103_v21  ;;  %v123_v41 = vsub.f32 %v215_v3, %v119_v37  ;;  %v124_v42 = vsub.f32 %v220_v4, %v120_v38 }
  0x1a   :  { %v109_v27 = vadd.f32 1e-05, %v105_v23  ;;  %v110_v28 = vadd.f32 1e-05, %v106_v24  ;;  %v145_v40 = vsub.s32 %v142_v34, %v144_v35 }
  0x1b   :  { %v108_v26 = vadd.f32 1e-05, %v104_v22  ;;  %176 = vrsqrt.f32 %v107_v25 }
  0x1d   :  { %178 = vrsqrt.f32 %v108_v26 }
  0x1e   :  { %180 = vrsqrt.f32 %v109_v27 }
  0x1f   :  { %182 = vrsqrt.f32 %v110_v28 }
  0x25   :  { %v177_v32 = vpop.eup %176 }
  0x27   :  { %v179_v33 = vpop.eup %178 }
  0x28   :  { %v181_v36 = vpop.eup %180  ;;  %v129_v43 = vcombine.low %v177_v32, %v179_v33 }
  0x29   :  { %v183_v39 = vpop.eup %182 }
  0x2a   :  { %v130_v44 = vcombine.low %v181_v36, %v183_v39  ;;  %v133_v46 = vmul.f32 %v129_v43, %v123_v41 }
  0x2c   :  { %v134_v47 = vmul.f32 %v130_v44, %v124_v42 }
  0x81   :  { %v139_v45 = vpop.permute.xlu0 %138 }
  0x82   :  { %v146_v48 = vrot.slane %v139_v45, %v145_v40 }
  0x84   :  { %v148_v50 = vmul.f32 %v146_v48, %v133_v46  ;;  %v149_v51 = vmul.f32 %v146_v48, %v134_v47 }
  0x85   :  { %v154_v49 = vpop.permute.xlu0 %153 }
  0x86   :  { %v161_v52 = vrot.slane %v154_v49, %v145_v40 }
  0x88   :  { %v163_v53 = vadd.f32 %v161_v52, %v148_v50  ;;  %v164_v54 = vadd.f32 %v161_v52, %v149_v51 }
  0x8a   :  { %165 = vst [vmem:[%s251_s3] sm:$0xff] %v163_v53  ;;  %166 = vst [vmem:[%s251_s3 + $0x8] sm:$0xff] %v164_v54 }

</bundles_post_ra>
